<compile_context>
chip_gen: v7x
topology: tpu7x:2x2x1
jax: 0.10.0
libtpu: 0.0.40
codegen_flags: <defaults>
</compile_context>

<pallas_src>
import functools

import jax
import jax.numpy as jnp
from jax.experimental import pallas as pl
from jax.experimental.pallas import tpu as pltpu

BN_EPS = 1e-5
LANE = 128


def _round_up(n, m):
    return ((n + m - 1) // m) * m


def fcn_kernel(x_ref, w1_ref, w2_ref, w3_ref, vec_ref, o_ref):
    h_pad = w1_ref.shape[1]        # padded hidden width (multiple of 128)
    mid = w2_ref.shape[1]          # 256
    out_pad = w3_ref.shape[1]      # padded output width (multiple of 128)
    mm_dtype = w1_ref.dtype        # bf16 (default) or f32 matmul operands

    # Packed 1-D params (f32; elementwise math stays f32 on all chips).
    b1 = vec_ref[0:1, 0:h_pad]     # [1, h_pad]
    gamma = vec_ref[1:2, 0:h_pad]  # [1, h_pad]
    beta = vec_ref[2:3, 0:h_pad]   # [1, h_pad]
    b2 = vec_ref[3:4, 0:mid]       # [1, 256]
    b3 = vec_ref[4:5, 0:out_pad]   # [1, out_pad]

    x = x_ref[...].astype(mm_dtype)                             # [B, D_in]

    # fc1 + ReLU (MXU, f32 accumulate)
    h1 = jnp.dot(x, w1_ref[...], preferred_element_type=jnp.float32) + b1
    h1 = jnp.maximum(h1, 0.0)                                   # [B, h_pad]

    # BatchNorm1d, training mode: batch statistics, biased variance
    # (two-pass diff*diff form for numerical safety). Padded feature lanes
    # are identically 0 and stay 0 through this block.
    mean = jnp.mean(h1, axis=0, keepdims=True)                  # [1, h_pad]
    diff = h1 - mean
    var = jnp.mean(diff * diff, axis=0, keepdims=True)          # [1, h_pad]
    hn = diff * jax.lax.rsqrt(var + BN_EPS) * gamma + beta      # [B, h_pad]

    # fc2 + ReLU
    h2 = jnp.dot(hn.astype(mm_dtype), w2_ref[...],
                 preferred_element_type=jnp.float32) + b2
    h2 = jnp.maximum(h2, 0.0)                                   # [B, 256]

    # fc3 (lane-dense padded output -> unmasked full-width store)
    out = jnp.dot(h2.astype(mm_dtype), w3_ref[...],
                  preferred_element_type=jnp.float32) + b3
    o_ref[...] = out.astype(o_ref.dtype)                        # [B, out_pad]


def prepare_params(params, use_bf16=True):
    """One-time layout prep: transpose to [in, out], zero-pad lane dims to 128,
    cast weights to the matmul dtype, pack all 1-D params into one slab."""
    w1_t = params["w1"].T      # [IN, H]
    w2_t = params["w2"].T      # [H, 256]
    w3_t = params["w3"].T      # [256, OUT]
    IN, H = w1_t.shape
    MID = w2_t.shape[1]
    OUT = w3_t.shape[1]

    h_pad = _round_up(H, LANE)
    mid_pad = _round_up(MID, LANE)
    out_pad = _round_up(OUT, LANE)
    mm_dtype = jnp.bfloat16 if use_bf16 else jnp.float32

    w1p = jnp.zeros((IN, h_pad), mm_dtype).at[:, :H].set(w1_t.astype(mm_dtype))
    w2p = jnp.zeros((h_pad, mid_pad), mm_dtype).at[:H, :MID].set(w2_t.astype(mm_dtype))
    w3p = jnp.zeros((mid_pad, out_pad), mm_dtype).at[:MID, :OUT].set(w3_t.astype(mm_dtype))

    vec_w = max(h_pad, mid_pad, out_pad)
    vec = jnp.zeros((8, vec_w), jnp.float32)
    vec = vec.at[0, :H].set(params["b1"])
    vec = vec.at[1, :H].set(params["gamma"])
    vec = vec.at[2, :H].set(params["beta"])
    vec = vec.at[3, :MID].set(params["b2"])
    vec = vec.at[4, :OUT].set(params["b3"])

    return {"w1p": w1p, "w2p": w2p, "w3p": w3p, "vec": vec, "out_size": OUT}


@functools.partial(jax.jit, static_argnames=("out_size",))
def _fcn_forward_impl(x, w1p, w2p, w3p, vec, out_size):
    B = x.shape[0]
    out_pad = w3p.shape[1]
    args = (x, w1p, w2p, w3p, vec)

    full = lambda a: pl.BlockSpec(a.shape, lambda: (0,) * a.ndim)

    flops = 2 * B * (w1p.shape[0] * w1p.shape[1]
                     + w2p.shape[0] * w2p.shape[1]
                     + w3p.shape[0] * w3p.shape[1])
    bytes_accessed = sum(a.size * a.dtype.itemsize for a in args) + B * out_pad * 4

    out_padded = pl.pallas_call(
        fcn_kernel,
        out_shape=jax.ShapeDtypeStruct((B, out_pad), jnp.float32),
        grid_spec=pltpu.PrefetchScalarGridSpec(
            num_scalar_prefetch=0,
            grid=(),
            in_specs=[full(a) for a in args],
            out_specs=pl.BlockSpec((B, out_pad), lambda: (0, 0)),
        ),
        cost_estimate=pl.CostEstimate(
            flops=flops, transcendentals=0, bytes_accessed=bytes_accessed),
    )(*args)
    return out_padded[:, :out_size]


def fcn_forward(x, prepped):
    """x: [B, input_size] float32. prepped: output of prepare_params (static layout)."""
    return _fcn_forward_impl(x, prepped["w1p"], prepped["w2p"], prepped["w3p"],
                             prepped["vec"], prepped["out_size"])


def init_params(key, input_size, hidden_size, out_size):
    ks = jax.random.split(key, 6)

    def lin(kw, kb, fan_in, fan_out):
        bound = 1.0 / jnp.sqrt(fan_in)
        w = jax.random.uniform(kw, (fan_out, fan_in), jnp.float32, -bound, bound)
        b = jax.random.uniform(kb, (fan_out,), jnp.float32, -bound, bound)
        return w, b

    w1, b1 = lin(ks[0], ks[1], input_size, hidden_size)
    w2, b2 = lin(ks[2], ks[3], hidden_size, 256)
    w3, b3 = lin(ks[4], ks[5], 256, out_size)
    return {
        "w1": w1, "b1": b1,
        "gamma": jnp.ones((hidden_size,), jnp.float32),   # BatchNorm1d init
        "beta": jnp.zeros((hidden_size,), jnp.float32),
        "w2": w2, "b2": b2,
        "w3": w3, "b3": b3,
    }


if __name__ == "__main__":
    input_size, hidden_size, out_size = 32, 64, 16
    B = 8

    key = jax.random.PRNGKey(0)
    kx, kp = jax.random.split(key)
    x = jax.random.normal(kx, (B, input_size), jnp.float32)
    params = init_params(kp, input_size, hidden_size, out_size)

    prepped = prepare_params(params, use_bf16=True)   # one-time layout prep
    out = fcn_forward(x, prepped)
    jax.block_until_ready(out)

    # Reference 1: same math as the kernel (bf16 matmul operands, f32 accumulate
    # and f32 elementwise) -- should match tightly.
    mm = jnp.bfloat16
    h1 = jnp.dot(x.astype(mm), params["w1"].T.astype(mm),
                 preferred_element_type=jnp.float32) + params["b1"]
    h1 = jnp.maximum(h1, 0.0)
    m = h1.mean(0, keepdims=True)
    d = h1 - m
    v = (d * d).mean(0, keepdims=True)
    hn = d * jax.lax.rsqrt(v + BN_EPS) * params["gamma"] + params["beta"]
    h2 = jnp.dot(hn.astype(mm), params["w2"].T.astype(mm),
                 preferred_element_type=jnp.float32) + params["b2"]
    h2 = jnp.maximum(h2, 0.0)
    ref_bf16 = jnp.dot(h2.astype(mm), params["w3"].T.astype(mm),
                       preferred_element_type=jnp.float32) + params["b3"]
    assert jnp.allclose(out, ref_bf16, atol=1e-3, rtol=1e-3), "mismatch vs bf16 reference"

    # Reference 2: pure-f32 forward -- loose check that bf16 operands keep the
    # module semantics intact.
    h1f = jnp.maximum(x @ params["w1"].T + params["b1"], 0.0)
    mf = h1f.mean(0, keepdims=True)
    vf = ((h1f - mf) ** 2).mean(0, keepdims=True)
    hnf = (h1f - mf) * jax.lax.rsqrt(vf + BN_EPS) * params["gamma"] + params["beta"]
    h2f = jnp.maximum(hnf @ params["w2"].T + params["b2"], 0.0)
    ref_f32 = h2f @ params["w3"].T + params["b3"]
    assert jnp.allclose(out, ref_f32, atol=5e-2, rtol=5e-2), "mismatch vs f32 reference"

    print("KERNEL_OK")
</pallas_src>

<mosaic_0001>
module attributes {stable_mosaic.version = 11 : i64} {
  func.func @fcn_kernel(%arg0: memref<8x32xf32, #tpu.memory_space<vmem>>, %arg1: memref<32x128xbf16, #tpu.memory_space<vmem>>, %arg2: memref<128x256xbf16, #tpu.memory_space<vmem>>, %arg3: memref<256x128xbf16, #tpu.memory_space<vmem>>, %arg4: memref<8x256xf32, #tpu.memory_space<vmem>>, %arg5: memref<8x128xf32, #tpu.memory_space<vmem>>) attributes {dimension_semantics = [], scalar_prefetch = 0 : i64, scratch_operands = 0 : i64, tpu.core_type = #tpu.core_type<tc>} {
    %c0 = arith.constant 0 : index
    %c0_0 = arith.constant 0 : index
    %0 = vector.load %arg4[%c0, %c0_0] : memref<8x256xf32, #tpu.memory_space<vmem>>, vector<1x128xf32>
    %c1 = arith.constant 1 : index
    %c0_1 = arith.constant 0 : index
    %1 = vector.load %arg4[%c1, %c0_1] : memref<8x256xf32, #tpu.memory_space<vmem>>, vector<1x128xf32>
    %c2 = arith.constant 2 : index
    %c0_2 = arith.constant 0 : index
    %2 = vector.load %arg4[%c2, %c0_2] : memref<8x256xf32, #tpu.memory_space<vmem>>, vector<1x128xf32>
    %c3 = arith.constant 3 : index
    %c0_3 = arith.constant 0 : index
    %3 = vector.load %arg4[%c3, %c0_3] : memref<8x256xf32, #tpu.memory_space<vmem>>, vector<1x256xf32>
    %c4 = arith.constant 4 : index
    %c0_4 = arith.constant 0 : index
    %4 = vector.load %arg4[%c4, %c0_4] : memref<8x256xf32, #tpu.memory_space<vmem>>, vector<1x128xf32>
    %c0_5 = arith.constant 0 : index
    %c0_6 = arith.constant 0 : index
    %5 = vector.load %arg0[%c0_5, %c0_6] : memref<8x32xf32, #tpu.memory_space<vmem>>, vector<8x32xf32>
    %6 = arith.truncf %5 : vector<8x32xf32> to vector<8x32xbf16>
    %c0_7 = arith.constant 0 : index
    %c0_8 = arith.constant 0 : index
    %7 = vector.load %arg1[%c0_7, %c0_8] : memref<32x128xbf16, #tpu.memory_space<vmem>>, vector<32x128xbf16>
    %cst = arith.constant dense<0.000000e+00> : vector<8x128xf32>
    %8 = tpu.matmul %6, %7, %cst {dimension_numbers = #tpu.dot_dimension_numbers<[1], [0], [0], [1], [0, 0, 1, 1], [], []>} : vector<8x32xbf16>, vector<32x128xbf16>, vector<8x128xf32> -> vector<8x128xf32>
    %9 = vector.broadcast %0 : vector<1x128xf32> to vector<8x128xf32>
    %10 = arith.addf %8, %9 : vector<8x128xf32>
    %cst_9 = arith.constant 0.000000e+00 : f32
    %11 = vector.broadcast %cst_9 : f32 to vector<8x128xf32>
    %12 = arith.maximumf %10, %11 : vector<8x128xf32>
    %cst_10 = arith.constant dense<0.000000e+00> : vector<128xf32>
    %13 = vector.multi_reduction <add>, %12, %cst_10 [0] : vector<8x128xf32> to vector<128xf32>
    %14 = vector.shape_cast %13 : vector<128xf32> to vector<1x128xf32>
    %cst_11 = arith.constant 8.000000e+00 : f32
    %15 = vector.broadcast %cst_11 : f32 to vector<1x128xf32>
    %16 = arith.divf %14, %15 : vector<1x128xf32>
    %17 = vector.broadcast %16 : vector<1x128xf32> to vector<8x128xf32>
    %18 = arith.subf %12, %17 : vector<8x128xf32>
    %19 = arith.mulf %18, %18 : vector<8x128xf32>
    %cst_12 = arith.constant dense<0.000000e+00> : vector<128xf32>
    %20 = vector.multi_reduction <add>, %19, %cst_12 [0] : vector<8x128xf32> to vector<128xf32>
    %21 = vector.shape_cast %20 : vector<128xf32> to vector<1x128xf32>
    %cst_13 = arith.constant 8.000000e+00 : f32
    %22 = vector.broadcast %cst_13 : f32 to vector<1x128xf32>
    %23 = arith.divf %21, %22 : vector<1x128xf32>
    %cst_14 = arith.constant 9.99999974E-6 : f32
    %24 = vector.broadcast %cst_14 : f32 to vector<1x128xf32>
    %25 = arith.addf %23, %24 : vector<1x128xf32>
    %26 = math.rsqrt %25 : vector<1x128xf32>
    %27 = vector.broadcast %26 : vector<1x128xf32> to vector<8x128xf32>
    %28 = arith.mulf %18, %27 : vector<8x128xf32>
    %29 = vector.broadcast %1 : vector<1x128xf32> to vector<8x128xf32>
    %30 = arith.mulf %28, %29 : vector<8x128xf32>
    %31 = vector.broadcast %2 : vector<1x128xf32> to vector<8x128xf32>
    %32 = arith.addf %30, %31 : vector<8x128xf32>
    %33 = arith.truncf %32 : vector<8x128xf32> to vector<8x128xbf16>
    %c0_15 = arith.constant 0 : index
    %c0_16 = arith.constant 0 : index
    %34 = vector.load %arg2[%c0_15, %c0_16] : memref<128x256xbf16, #tpu.memory_space<vmem>>, vector<128x256xbf16>
    %cst_17 = arith.constant dense<0.000000e+00> : vector<8x256xf32>
    %35 = tpu.matmul %33, %34, %cst_17 {dimension_numbers = #tpu.dot_dimension_numbers<[1], [0], [0], [1], [0, 0, 1, 1], [], []>} : vector<8x128xbf16>, vector<128x256xbf16>, vector<8x256xf32> -> vector<8x256xf32>
    %36 = vector.broadcast %3 : vector<1x256xf32> to vector<8x256xf32>
    %37 = arith.addf %35, %36 : vector<8x256xf32>
    %cst_18 = arith.constant 0.000000e+00 : f32
    %38 = vector.broadcast %cst_18 : f32 to vector<8x256xf32>
    %39 = arith.maximumf %37, %38 : vector<8x256xf32>
    %40 = arith.truncf %39 : vector<8x256xf32> to vector<8x256xbf16>
    %c0_19 = arith.constant 0 : index
    %c0_20 = arith.constant 0 : index
    %41 = vector.load %arg3[%c0_19, %c0_20] : memref<256x128xbf16, #tpu.memory_space<vmem>>, vector<256x128xbf16>
    %cst_21 = arith.constant dense<0.000000e+00> : vector<8x128xf32>
    %42 = tpu.matmul %40, %41, %cst_21 {dimension_numbers = #tpu.dot_dimension_numbers<[1], [0], [0], [1], [0, 0, 1, 1], [], []>} : vector<8x256xbf16>, vector<256x128xbf16>, vector<8x128xf32> -> vector<8x128xf32>
    %43 = vector.broadcast %4 : vector<1x128xf32> to vector<8x128xf32>
    %44 = arith.addf %42, %43 : vector<8x128xf32>
    %c0_22 = arith.constant 0 : index
    %c0_23 = arith.constant 0 : index
    %45 = vector.load %arg5[%c0_22, %c0_23] : memref<8x128xf32, #tpu.memory_space<vmem>>, vector<8x128xf32>
    tpu.vector_store %arg5[%c0_22, %c0_23], %44 {strides = array<i32>} : memref<8x128xf32, #tpu.memory_space<vmem>>, vector<8x128xf32>,
    return
  }
}

</mosaic_0001>

<bundles_post_ra>
// kernel: _fcn_forward_impl.1
= control target key start
LH: loop header
LB: loop body
LE: loop exit
PB: predicated region body
PF: predicated region fallthrough
CT: control target
= control target key end

     0   :  { %10 = vsyncpa [#allocation3], 0  ;;  %s896_s0 = inlined_call_operand.hbm [shape: f32[8,32], index: 0, kind: input, shape index: {}]   ;;  %s897_s1 = inlined_call_operand.hbm [shape: bf16[32,128], index: 1, kind: input, shape index: {}]   ;;  %s898_s2 = inlined_call_operand.hbm [shape: bf16[128,256], index: 2, kind: input, shape index: {}]   ;;  %s899_s3 = inlined_call_operand.hbm [shape: bf16[256,128], index: 3, kind: input, shape index: {}]   ;;  %s900_s4 = inlined_call_operand.hbm [shape: f32[8,256], index: 4, kind: input, shape index: {}]   ;;  %s901_s5 = inlined_call_operand.hbm [shape: f32[8,128], index: 5, kind: output, shape index: {}]  }
   0x1   :  { %11 = vsyncpa [#allocation6], 0 }
   0x2   :  { %12 = vsyncpa [#allocation9], 0 }
   0x3   :  { %13 = vsyncpa [#allocation4], 0  ;;  %s781_s18 = smov [#allocation5]   ;;  %s641_s22 = scalar_lea.hbm %s897_s1, 256 }
   0x4   :  { %s29_s19 = sshll.u32 %s781_s18, 4  ;;  %p642_p0 = scmp.ne.s32.totalorder %s897_s1, %s641_s22  ;;  %s30_s19 = int_to_ptr.vmem [resolvable:$true] %s29_s19 }
   0x5   :  { %p645_p1 = scmp.lt.u32.totalorder %s641_s22, %s897_s1 }
   0x7   :  { %p647_p2 = pnand %p645_p1, %p642_p0 }
   0x9   :  { %650 = shalt.err (!%p647_p2)
}
   0xa   :  { %s651_s27 = scalar_lea.vmem %s30_s19, 256  ;;  %p656_p4 = scmp.lt.s32.totalorder %s30_s19, %s30_s19 }
   0xb   :  { %p652_p3 = scmp.ne.s32.totalorder %s30_s19, %s651_s27  ;;  %p657_p5 = scmp.lt.s32.totalorder %s651_s27, %s651_s27 }
   0xd   :  { %p658_p6 = por %p657_p5, %p656_p4 }
   0xf   :  { %p659_p7 = pnand %p658_p6, %p652_p3 }
  0x11   :  { %662 = shalt.err (!%p659_p7)
}
  0x12   :  { %s782_s28 = smov 64   ;;  %s783_s29 = smov 4  }
  0x13   :  { %35 = dma.hbm_to_vmem [thread:$0]  %s897_s1, 256, %s30_s19, [#allocation6], %s782_s28, %s782_s28, %s783_s29  }
  0x14   :  { %s784_s7 = smov [#allocation8]   ;;  %s785_s9 = smov [#allocation2]  }
  0x15   :  { %s53_s8 = sshll.u32 %s784_s7, 4  ;;  %s20_s10 = sshll.u32 %s785_s9, 4  ;;  %s54_s8 = int_to_ptr.vmem [resolvable:$true] %s53_s8  ;;  %s21_s10 = int_to_ptr.vmem [resolvable:$true] %s20_s10 }
  0x16   :  { %s663_s13 = scalar_lea.hbm %s899_s3, 2048 }
  0x17   :  { %p664_p8 = scmp.ne.s32.totalorder %s899_s3, %s663_s13  ;;  %p667_p9 = scmp.lt.u32.totalorder %s663_s13, %s899_s3 }
  0x19   :  { %p669_p10 = pnand %p667_p9, %p664_p8 }
  0x1b   :  { %672 = shalt.err (!%p669_p10)
}
  0x1c   :  { %s673_s1 = scalar_lea.vmem %s54_s8, 2048  ;;  %p678_p12 = scmp.lt.s32.totalorder %s54_s8, %s54_s8 }
  0x1d   :  { %p674_p11 = scmp.ne.s32.totalorder %s54_s8, %s673_s1  ;;  %p679_p13 = scmp.lt.s32.totalorder %s673_s1, %s673_s1 }
  0x1f   :  { %p680_p0 = por %p679_p13, %p678_p12 }
  0x21   :  { %p681_p1 = pnand %p680_p0, %p674_p11 }
  0x23   :  { %684 = shalt.err (!%p681_p1)
}
  0x24   :  { %59 = dma.hbm_to_vmem [thread:$0]  %s899_s3, 2048, %s54_s8, [#allocation9], %s782_s28, %s782_s28, %s783_s29  }
  0x25   :  { %s685_s22 = scalar_lea.hbm %s896_s0, 128 }
  0x26   :  { %p686_p2 = scmp.ne.s32.totalorder %s896_s0, %s685_s22  ;;  %p689_p3 = scmp.lt.u32.totalorder %s685_s22, %s896_s0 }
  0x28   :  { %p691_p4 = pnand %p689_p3, %p686_p2 }
  0x2a   :  { %694 = shalt.err (!%p691_p4)
}
  0x2b   :  { %s695_s27 = scalar_lea.vmem %s21_s10, 128  ;;  %p700_p6 = scmp.lt.s32.totalorder %s21_s10, %s21_s10 }
  0x2c   :  { %p696_p5 = scmp.ne.s32.totalorder %s21_s10, %s695_s27  ;;  %p701_p7 = scmp.lt.s32.totalorder %s695_s27, %s695_s27 }
  0x2e   :  { %p702_p8 = por %p701_p7, %p700_p6 }
  0x30   :  { %p703_p9 = pnand %p702_p8, %p696_p5 }
  0x32   :  { %706 = shalt.err (!%p703_p9)
}
  0x33   :  { %23 = dma.hbm_to_vmem [thread:$0]  %s896_s0, 128, %s21_s10, [#allocation3]  }
  0x34   :  { %s786_s29 = smov [#allocation7]   ;;  %s707_s8 = scalar_lea.hbm %s898_s2, 2048 }
  0x35   :  { %s41_s30 = sshll.u32 %s786_s29, 4  ;;  %p708_p10 = scmp.ne.s32.totalorder %s898_s2, %s707_s8  ;;  %s42_s30 = int_to_ptr.vmem [resolvable:$true] %s41_s30 }
  0x36   :  { %p711_p11 = scmp.lt.u32.totalorder %s707_s8, %s898_s2 }
  0x38   :  { %p713_p12 = pnand %p711_p11, %p708_p10 }
  0x3a   :  { %716 = shalt.err (!%p713_p12)
}
  0x3b   :  { %s717_s14 = scalar_lea.vmem %s42_s30, 2048  ;;  %p722_p0 = scmp.lt.s32.totalorder %s42_s30, %s42_s30 }
  0x3c   :  { %p718_p13 = scmp.ne.s32.totalorder %s42_s30, %s717_s14  ;;  %p723_p1 = scmp.lt.s32.totalorder %s717_s14, %s717_s14 }
  0x3e   :  { %p724_p2 = por %p723_p1, %p722_p0 }
  0x40   :  { %p725_p3 = pnand %p724_p2, %p718_p13 }
  0x42   :  { %728 = shalt.err (!%p725_p3)
}
  0x43   :  { %s787_s0 = smov 128   ;;  %s788_s10 = smov 8  }
  0x44   :  { %47 = dma.hbm_to_vmem [thread:$0]  %s898_s2, 2048, %s42_s30, [#allocation6], %s787_s0, %s787_s0, %s788_s10  }
  0x45   :  { %s789_s17 = smov [#allocation10]   ;;  %s729_s20 = scalar_lea.hbm %s900_s4, 256 }
  0x46   :  { %s66_s1 = sshll.u32 %s789_s17, 4  ;;  %p730_p4 = scmp.ne.s32.totalorder %s900_s4, %s729_s20  ;;  %s67_s1 = int_to_ptr.vmem [resolvable:$true] %s66_s1 }
  0x47   :  { %p733_p5 = scmp.lt.u32.totalorder %s729_s20, %s900_s4 }
  0x49   :  { %p735_p6 = pnand %p733_p5, %p730_p4 }
  0x4b   :  { %738 = shalt.err (!%p735_p6)
}
  0x4c   :  { %s739_s25 = scalar_lea.vmem %s67_s1, 256  ;;  %p744_p8 = scmp.lt.s32.totalorder %s67_s1, %s67_s1 }
  0x4d   :  { %p740_p7 = scmp.ne.s32.totalorder %s67_s1, %s739_s25  ;;  %p745_p9 = scmp.lt.s32.totalorder %s739_s25, %s739_s25 }
  0x4f   :  { %p746_p10 = por %p745_p9, %p744_p8 }
  0x51   :  { %p747_p11 = pnand %p746_p10, %p740_p7 }
  0x53   :  { %750 = shalt.err (!%p747_p11)
}
  0x54   :  { %69 = dma.hbm_to_vmem [thread:$0]  %s900_s4, 256, %s67_s1, [#allocation9]  }
  0x55   :  { %773 = dma.done.wait [#allocation3], 128  }
  0x56   :  { %774 = vsyncadd [#allocation3], 4294967168 }
  0x57   :  { %775 = dma.done.wait [#allocation6], 2304  }
  0x58   :  { %776 = vsyncadd [#allocation6], 4294964992 }
  0x59   :  { %777 = dma.done.wait [#allocation9], 2304  }
  0x5a   :  { %778 = vsyncadd [#allocation9], 4294964992  ;;  %v790_v0 = vmov 0.0   ;;  %vm791_vm0 = vmmov 0   ;;  %v597_v1 = vld [vmem:[#allocation5] sm:$0xff]   ;;  %v598_v2 = vld [vmem:[#allocation5 + $0x8] sm:$0xff]  }
  0x5b   :  { %576 = vmatprep.subr.bf16.mxu0 %v790_v0  ;;  %580 = vmatprep.mubr.msk.bf16.mxu0 %vm791_vm0, %v790_v0  ;;  %v92_v3 = vld [vmem:[#allocation2] sm:$0xff]  ;;  %vm110_vm1 = vcmask 261120   ;;  %v602_v7 = vld [vmem:[#allocation7 + $0x14] ss:$8 sps:$4 sm:$0xff]   ;;  %v604_v8 = vld [vmem:[#allocation7 + $0x10] ss:$8 sps:$4 sm:$0xff]  }
  0x5c   :  { %577 = vmatpush3.bf16.msra.mxu0 %v597_v1  ;;  %v93_v4 = vpack.c.bf16 %v92_v3, %v92_v3  ;;  %v599_v5 = vld [vmem:[#allocation7 + $0x4] ss:$8 sps:$4 sm:$0xff]   ;;  %v601_v6 = vld [vmem:[#allocation7] ss:$8 sps:$4 sm:$0xff]   ;;  %v608_v11 = vld [vmem:[#allocation7 + $0x34] ss:$8 sps:$4 sm:$0xff]  }
  0x5d   :  { %578 = vmatprep.subr.bf16.mxu0 %v790_v0  ;;  %285 = vmatprep.subr.bf16.mxu1 %v599_v5  ;;  %v605_v9 = vld [vmem:[#allocation7 + $0x24] ss:$8 sps:$4 sm:$0xff]   ;;  %v607_v10 = vld [vmem:[#allocation7 + $0x20] ss:$8 sps:$4 sm:$0xff]   ;;  %v610_v12 = vld [vmem:[#allocation7 + $0x30] ss:$8 sps:$4 sm:$0xff]   ;;  %v195_v5 = vlaneseq }
  0x5e   :  { %286 = vmatpush1.bf16.msra.mxu1 %v601_v6  ;;  %v611_v13 = vld [vmem:[#allocation7 + $0x44] ss:$8 sps:$4 sm:$0xff]   ;;  %v613_v14 = vld [vmem:[#allocation7 + $0x40] ss:$8 sps:$4 sm:$0xff]   ;;  %v614_v15 = vld [vmem:[#allocation7 + $0x54] ss:$8 sps:$4 sm:$0xff]  }
  0x5f   :  { %287 = vmatprep.subr.bf16.mxu1 %v602_v7  ;;  %v616_v16 = vld [vmem:[#allocation7 + $0x50] ss:$8 sps:$4 sm:$0xff]   ;;  %v617_v17 = vld [vmem:[#allocation7 + $0x64] ss:$8 sps:$4 sm:$0xff]   ;;  %v619_v18 = vld [vmem:[#allocation7 + $0x60] ss:$8 sps:$4 sm:$0xff]  }
  0x60   :  { %579 = vmatpush3.bf16.msra.mxu0 %v598_v2  ;;  %v620_v19 = vld [vmem:[#allocation7 + $0x74] ss:$8 sps:$4 sm:$0xff]   ;;  %v622_v20 = vld [vmem:[#allocation7 + $0x70] ss:$8 sps:$4 sm:$0xff]   ;;  %v792_v21 = vmov 0   ;;  %v623_v22 = vld [vmem:[#allocation8 + $0x40] sm:$0xff]  }
  0x61   :  { %317 = vmatprep.mubr.bf16.mxu1 %v792_v21  ;;  %v624_v23 = vld [vmem:[#allocation8] sm:$0xff]   ;;  %v625_v24 = vld [vmem:[#allocation8 + $0x48] sm:$0xff]   ;;  %554 = vmatprep.subr.bf16.mxu0 %v623_v22  ;;  %v627_v26 = vld [vmem:[#allocation8 + $0x50] sm:$0xff]   ;;  %v196_v6 = vshrl.u32 %v195_v5, 7  ;;  %s793_s4 = smov [#allocation11]  }
  0x62   :  { %288 = vmatpush1.bf16.msra.mxu1 %v604_v8  ;;  %v626_v25 = vld [vmem:[#allocation8 + $0x8] sm:$0xff]   ;;  %v628_v27 = vld [vmem:[#allocation8 + $0x10] sm:$0xff]   ;;  %v629_v28 = vld [vmem:[#allocation8 + $0x58] sm:$0xff]   ;;  %s505_s27 = sshll.u32 %s793_s4, 4  ;;  %s506_s27 = int_to_ptr.vmem [resolvable:$true] %s505_s27 }
  0x63   :  { %581 = vmatmul.mubr.msk.bf16.vlgmr.msra.gmra.mrb[0].mxu0 %vm110_vm1, %v93_v4  ;;  %289 = vmatprep.subr.bf16.mxu1 %v605_v9  ;;  %v630_v29 = vld [vmem:[#allocation8 + $0x18] sm:$0xff]   ;;  %v631_v30 = vld [vmem:[#allocation8 + $0x60] sm:$0xff]   ;;  %v633_v32 = vld [vmem:[#allocation8 + $0x68] sm:$0xff]   ;;  %v197_v7 = vsub.s32 0, %v196_v6  ;;  %v201_v9 = vsub.s32 1, %v196_v6  ;;  %s751_s3 = scalar_lea.vmem %s506_s27, 128  ;;  %p756_p13 = scmp.lt.s32.totalorder %s506_s27, %s506_s27 }
  0x64   :  { %555 = vmatpush3.bf16.msra.mxu0 %v624_v23  ;;  %v632_v31 = vld [vmem:[#allocation8 + $0x20] sm:$0xff]   ;;  %v634_v33 = vld [vmem:[#allocation8 + $0x28] sm:$0xff]   ;;  %v635_v1 = vld [vmem:[#allocation8 + $0x70] sm:$0xff]   ;;  %p752_p12 = scmp.ne.s32.totalorder %s506_s27, %s751_s3  ;;  %p757_p0 = scmp.lt.s32.totalorder %s751_s3, %s751_s3 }
  0x65   :  { %556 = vmatprep.subr.bf16.mxu0 %v625_v24  ;;  %v86_v34 = vld [vmem:[#allocation10] ss:$0 sm:$0xff]  ;;  %v87_v59 = vld [vmem:[#allocation10 + $0x1] ss:$0 sm:$0xff]  ;;  %v88_v61 = vld [vmem:[#allocation10 + $0x2] ss:$0 sm:$0xff] }
  0x66   :  { %290 = vmatpush1.bf16.msra.mxu1 %v607_v10  ;;  %v636_v2 = vld [vmem:[#allocation8 + $0x30] sm:$0xff]   ;;  %v637_v3 = vld [vmem:[#allocation8 + $0x78] sm:$0xff]   ;;  %v90_v8 = vld [vmem:[#allocation10 + $0x3] ss:$8 sm:$0x3]  ;;  %p758_p1 = por %p757_p0, %p756_p13 }
  0x67   :  { %291 = vmatprep.subr.bf16.mxu1 %v608_v11  ;;  %v638_v4 = vld [vmem:[#allocation8 + $0x38] sm:$0xff]   ;;  %v198_v10 = vrot.slane %v90_v8, %v197_v7  ;;  %v202_v11 = vrot.slane %v90_v8, %v201_v9  ;;  %v91_v23 = vld [vmem:[#allocation10 + $0x4] ss:$0 sm:$0xff] }
  0x68   :  { %557 = vmatpush3.bf16.msra.mxu0 %v626_v25  ;;  %p759_p2 = pnand %p758_p1, %p752_p12 }
  0x69   :  { %558 = vmatprep.subr.bf16.mxu0 %v627_v26 }
  0x6a   :  { %292 = vmatpush1.bf16.msra.mxu1 %v610_v12 }
  0x6b   :  { %293 = vmatprep.subr.bf16.mxu1 %v611_v13 }
  0x6c   :  { %559 = vmatpush3.bf16.msra.mxu0 %v628_v27 }
  0x6d   :  { %560 = vmatprep.subr.bf16.mxu0 %v629_v28 }
  0x6e   :  { %294 = vmatpush1.bf16.msra.mxu1 %v613_v14 }
  0x6f   :  { %295 = vmatprep.subr.bf16.mxu1 %v614_v15 }
  0x70   :  { %561 = vmatpush3.bf16.msra.mxu0 %v630_v29 }
  0x71   :  { %562 = vmatprep.subr.bf16.mxu0 %v631_v30 }
  0x72   :  { %296 = vmatpush1.bf16.msra.mxu1 %v616_v16 }
  0x73   :  { %297 = vmatprep.subr.bf16.mxu1 %v617_v17 }
  0x74   :  { %563 = vmatpush3.bf16.msra.mxu0 %v632_v31 }
  0x75   :  { %564 = vmatprep.subr.bf16.mxu0 %v633_v32 }
  0x76   :  { %298 = vmatpush1.bf16.msra.mxu1 %v619_v18 }
  0x77   :  { %299 = vmatprep.subr.bf16.mxu1 %v620_v19 }
  0x78   :  { %565 = vmatpush3.bf16.msra.mxu0 %v634_v33 }
  0x79   :  { %566 = vmatprep.subr.bf16.mxu0 %v635_v1 }
  0x7a   :  { %300 = vmatpush1.bf16.msra.mxu1 %v622_v20 }
  0x7c   :  { %567 = vmatpush3.bf16.msra.mxu0 %v636_v2 }
  0x7d   :  { %568 = vmatprep.subr.bf16.mxu0 %v637_v3 }
  0x80   :  { %569 = vmatpush3.bf16.msra.mxu0 %v638_v4 }
 0x136   :  { %v148_v35 = vpop.f32.mrb[0].mxu0 }
 0x137   :  { %v149_v36 = vadd.f32 %v148_v35, %v86_v34  ;;  %v582_v37 = vpop.f32.mrb[1].mxu0 }
 0x138   :  { %v151_v38 = vpop.f32.mrb[2].mxu0 }
 0x139   :  { %v154_v39 = vmax.f32 %v149_v36, 0.0  ;;  %v583_v40 = vpop.f32.mrb[3].mxu0 }
 0x13b   :  { %v155_v41 = vrot.slane %v154_v39, 4 }
 0x13d   :  { %v156_v42 = vadd.f32 %v155_v41, %v154_v39 }
 0x13f   :  { %v157_v43 = vrot.slane %v156_v42, 2 }
 0x141   :  { %v158_v44 = vadd.f32 %v157_v43, %v156_v42 }
 0x143   :  { %v159_v45 = vrot.slane %v158_v44, 1 }
 0x145   :  { %v160_v46 = vadd.f32 %v159_v45, %v158_v44 }
 0x147   :  { %v162_v47 = vmul.f32 0.125, %v160_v46 }
 0x149   :  { %v163_v48 = vsub.f32 %v154_v39, %v162_v47 }
 0x14b   :  { %v164_v49 = vmul.f32 %v163_v48, %v163_v48 }
 0x14d   :  { %v165_v50 = vrot.slane %v164_v49, 4 }
 0x14f   :  { %v166_v51 = vadd.f32 %v165_v50, %v164_v49 }
 0x151   :  { %v167_v52 = vrot.slane %v166_v51, 2 }
 0x153   :  { %v168_v53 = vadd.f32 %v167_v52, %v166_v51 }
 0x155   :  { %v169_v54 = vrot.slane %v168_v53, 1 }
 0x157   :  { %v170_v55 = vadd.f32 %v169_v54, %v168_v53 }
 0x159   :  { %v171_v56 = vmul.f32 0.125, %v170_v55 }
 0x15b   :  { %v172_v57 = vadd.f32 1e-05, %v171_v56 }
 0x15d   :  { %639 = vrsqrt.f32 %v172_v57 }
 0x167   :  { %v640_v58 = vpop.eup %639 }
 0x168   :  { %v174_v60 = vmul.f32 %v640_v58, %v163_v48 }
 0x16a   :  { %v175_v62 = vmul.f32 %v174_v60, %v87_v59 }
 0x16c   :  { %v176_v63 = vadd.f32 %v175_v62, %v88_v61 }
 0x16e   :  { %v177_v0 = vpack.c.bf16 %v176_v63, %v176_v63 }
 0x170   :  { %318 = vmatmul.mubr.bf16.vlgmr.msra.gmra.mrb[0].mxu1 %v177_v0 }
 0x243   :  { %v319_v12 = vpop.f32.mrb[0].mxu1 }
 0x244   :  { %v320_v13 = vadd.f32 %v319_v12, %v198_v10  ;;  %v321_v14 = vpop.f32.mrb[1].mxu1 }
 0x245   :  { %v322_v15 = vadd.f32 %v321_v14, %v202_v11  ;;  %v323_v16 = vpop.f32.mrb[2].mxu1 }
 0x246   :  { %v326_v17 = vmax.f32 %v320_v13, 0.0  ;;  %v324_v18 = vpop.f32.mrb[3].mxu1 }
 0x247   :  { %v327_v19 = vmax.f32 %v322_v15, 0.0 }
 0x248   :  { %v328_v21 = vpack.c.bf16 %v326_v17, %v326_v17 }
 0x249   :  { %v329_v20 = vpack.c.bf16 %v327_v19, %v327_v19 }
 0x24b   :  { %490 = vmatprep.mubr.bf16.mxu0 %v329_v20 }
 0x24c   :  { %491 = vmatmul.mubr.bf16.vlgmr.msra.gmra.mrb[4].mxu0 %v328_v21 }
 0x31f   :  { %v570_v22 = vpop.f32.mrb[4].mxu0 }
 0x320   :  { %v571_v24 = vpop.f32.mrb[5].mxu0 }
 0x321   :  { %v572_v25 = vadd.f32 %v571_v24, %v570_v22  ;;  %v573_v26 = vpop.f32.mrb[6].mxu0 }
 0x322   :  { %v574_v27 = vpop.f32.mrb[7].mxu0 }
 0x323   :  { %v493_v28 = vadd.f32 %v572_v25, %v91_v23 }
 0x325   :  { %498 = vst [vmem:[#allocation11] sm:$0xff] %v493_v28 }
 0x326   :  { %762 = shalt.err (!%p759_p2)
}
 0x327   :  { %s763_s30 = scalar_lea.hbm %s901_s5, 128 }
 0x328   :  { %p764_p3 = scmp.ne.s32.totalorder %s901_s5, %s763_s30  ;;  %p767_p4 = scmp.lt.u32.totalorder %s763_s30, %s901_s5 }
 0x32a   :  { %p769_p5 = pnand %p767_p4, %p764_p3 }
 0x32c   :  { %772 = shalt.err (!%p769_p5)
}
 0x32d   :  { %508 = dma.vmem_to_hbm [thread:$0]  %s506_s27, 128, %s901_s5, [#allocation4]  }
 0x32e   :  { %779 = dma.done.wait [#allocation4], 128  }
 0x32f   :  { %780 = vsyncadd [#allocation4], 4294967168 }
 0x330   :  { %512 = vsyncpa [#allocation3], 1 }
 0x331   :  { %513 = vsyncpa [#allocation6], 1 }
 0x332   :  { %514 = vsyncpa [#allocation9], 1 }
 0x333   :  { %515 = vsyncpa [#allocation4], 1 }

</bundles_post_ra>
